<compile_context>
chip_gen: v5e
topology: v5e:2x2
jax: 0.10.0
libtpu: 0.0.40
codegen_flags: <defaults>
</compile_context>

<pallas_src>
import jax
import jax.numpy as jnp
from jax import lax
from jax.experimental import pallas as pl
from jax.experimental.pallas import tpu as pltpu

FIVE = 200.0   # name kept from the reference (the value really is 200)


def _blayer_kernel(inputs_ref, mask_ref, mask_u_ref, r_mask_ref, r_out_ref,
                   w1_ref, w2_ref, w3_ref, w4_ref,
                   out_ref, loss_ref):
    # ---- mask normalization + stochastic binarization + mask_loss (f32) ----
    m = mask_ref[...]                                           # (O, I)
    n = m.shape[-1]
    mean = jnp.mean(m, axis=-1, keepdims=True)                  # (O, 1)
    # torch.std default is unbiased (ddof=1); no epsilon, matching torch
    var = jnp.sum((m - mean) ** 2, axis=-1, keepdims=True) / (n - 1)
    z = (m - mean) * lax.rsqrt(var) + mask_u_ref[...]           # (O, I)
    s = jax.nn.sigmoid(z)
    sl = jnp.sum(s, axis=-1, keepdims=True) - FIVE              # (O, 1)
    loss_ref[...] = jnp.mean(sl * sl, axis=0, keepdims=True)    # (1, 1)
    qmask = jnp.where(s >= r_mask_ref[...], 1.0, 0.0)           # (O, I) in {0,1}

    # ---- masked-input MLP chain, all O output features in one step ----
    x = inputs_ref[...][None, :, :] * qmask[:, None, :]         # (O, B, I) f32
    x = x.astype(jnp.bfloat16)

    h = jnp.einsum('obi,oih->obh', x, w1_ref[...],
                   preferred_element_type=jnp.float32)          # (O, B, H)
    h = jnp.maximum(h, 0.0)
    h = jnp.einsum('obh,ohk->obk', h.astype(jnp.bfloat16), w2_ref[...],
                   preferred_element_type=jnp.float32)
    h = jnp.maximum(h, 0.0)
    h = jnp.einsum('obh,ohk->obk', h.astype(jnp.bfloat16), w3_ref[...],
                   preferred_element_type=jnp.float32)
    h = jnp.maximum(h, 0.0)

    # W4 projection: y[o,b] = sum_h h[o,b,h] * w4[o,h]  (avoids a lane-1 matmul)
    w4 = w4_ref[...].astype(jnp.float32)                        # (O, H)
    y = jnp.sum(h * w4[:, None, :], axis=-1)                    # (O, B)

    sig = jax.nn.sigmoid(y.T)                                   # (B, O), lane-dense
    out_ref[...] = jnp.where(sig >= r_out_ref[...], 1.0, -1.0).astype(jnp.float32)


def init_params(key, in_features, out_features, hid):
    ks = jax.random.split(key, 5)
    mask = jax.random.normal(ks[0], (out_features, in_features), jnp.float32)
    mask_u = jnp.full(
        (out_features, 1),
        jnp.log(in_features / FIVE - 1.0) / -0.84737,
        jnp.float32,
    )
    W1 = jax.random.normal(ks[1], (out_features, in_features, hid), jnp.float32) / 2.236
    W2 = jax.random.normal(ks[2], (out_features, hid, hid), jnp.float32) / hid ** 0.5
    W3 = jax.random.normal(ks[3], (out_features, hid, hid), jnp.float32) / hid ** 0.5
    W4 = jax.random.normal(ks[4], (out_features, hid, 1), jnp.float32) / hid ** 0.5
    return dict(mask=mask, mask_u=mask_u, W1=W1, W2=W2, W3=W3, W4=W4)


@jax.jit
def blayer_forward(params, inputs, key):
    mask, mask_u = params["mask"], params["mask_u"]
    O, I = mask.shape
    B = inputs.shape[0]

    # bf16 weights for the MXU (accumulation stays f32 inside the kernel)
    W1 = params["W1"].astype(jnp.bfloat16)             # (O, I, H)
    W2 = params["W2"].astype(jnp.bfloat16)             # (O, H, H)
    W3 = params["W3"].astype(jnp.bfloat16)             # (O, H, H)
    W4 = params["W4"][:, :, 0].astype(jnp.bfloat16)    # (O, H)

    # pad batch to a multiple of 8 sublanes; padded rows are sliced off at the end
    B_pad = ((B + 7) // 8) * 8
    inputs_p = inputs if B_pad == B else jnp.pad(inputs, ((0, B_pad - B), (0, 0)))

    # deterministic uniforms for the two stochastic binarizations
    # TODO(synk): not bit-reproducible vs torch.cuda RNG (different streams).
    k_mask, k_out = jax.random.split(key)
    r_mask = jax.random.uniform(k_mask, (O, I), dtype=jnp.float32)
    r_out = jax.random.uniform(k_out, (B_pad, O), dtype=jnp.float32)

    out, mask_loss = pl.pallas_call(
        _blayer_kernel,
        out_shape=(
            jax.ShapeDtypeStruct((B_pad, O), jnp.float32),
            jax.ShapeDtypeStruct((1, 1), jnp.float32),
        ),
        compiler_params=pltpu.CompilerParams(
            # whole problem (<1 MiB resident) fits trivially on v5e/v6e/v7x VMEM
            vmem_limit_bytes=16 * 1024 * 1024,
        ),
    )(inputs_p, mask, mask_u, r_mask, r_out, W1, W2, W3, W4)

    return out[:B], mask_loss[0, 0]


if __name__ == "__main__":
    # in_features must exceed FIVE=200 or mask_u = log(I/FIVE - 1) is NaN (same as PyTorch)
    in_features, out_features, hid, batch = 256, 8, 32, 4

    key = jax.random.PRNGKey(0)
    k_param, k_input, k_rng = jax.random.split(key, 3)

    params = init_params(k_param, in_features, out_features, hid)
    inputs = jax.random.uniform(k_input, (batch, in_features), dtype=jnp.float32)

    x, mask_loss = blayer_forward(params, inputs, k_rng)
    jax.block_until_ready((x, mask_loss))

    assert x.shape == (batch, out_features)
    assert bool(jnp.all(jnp.abs(x) == 1.0))          # outputs are +/- 1
    assert mask_loss.shape == ()
    print("KERNEL_OK")
</pallas_src>

<mosaic_0001>
module attributes {stable_mosaic.version = 11 : i64} {
  func.func @_blayer_kernel(%arg0: memref<8x256xf32, #tpu.memory_space<vmem>>, %arg1: memref<8x256xf32, #tpu.memory_space<vmem>>, %arg2: memref<8x1xf32, #tpu.memory_space<vmem>>, %arg3: memref<8x256xf32, #tpu.memory_space<vmem>>, %arg4: memref<8x8xf32, #tpu.memory_space<vmem>>, %arg5: memref<8x256x32xbf16, #tpu.memory_space<vmem>>, %arg6: memref<8x32x32xbf16, #tpu.memory_space<vmem>>, %arg7: memref<8x32x32xbf16, #tpu.memory_space<vmem>>, %arg8: memref<8x32xbf16, #tpu.memory_space<vmem>>, %arg9: memref<8x8xf32, #tpu.memory_space<vmem>>, %arg10: memref<1x1xf32, #tpu.memory_space<vmem>>) attributes {dimension_semantics = [], scalar_prefetch = 0 : i64, scratch_operands = 0 : i64, tpu.core_type = #tpu.core_type<tc>} {
    %c0 = arith.constant 0 : index
    %c0_0 = arith.constant 0 : index
    %0 = vector.load %arg1[%c0, %c0_0] : memref<8x256xf32, #tpu.memory_space<vmem>>, vector<8x256xf32>
    %cst = arith.constant dense<0.000000e+00> : vector<8xf32>
    %1 = vector.multi_reduction <add>, %0, %cst [1] : vector<8x256xf32> to vector<8xf32>
    %2 = vector.shape_cast %1 : vector<8xf32> to vector<8x1xf32>
    %cst_1 = arith.constant 2.560000e+02 : f32
    %3 = vector.broadcast %cst_1 : f32 to vector<8x1xf32>
    %4 = arith.divf %2, %3 : vector<8x1xf32>
    %5 = vector.broadcast %4 : vector<8x1xf32> to vector<8x256xf32>
    %6 = arith.subf %0, %5 : vector<8x256xf32>
    %7 = arith.mulf %6, %6 : vector<8x256xf32>
    %cst_2 = arith.constant dense<0.000000e+00> : vector<8xf32>
    %8 = vector.multi_reduction <add>, %7, %cst_2 [1] : vector<8x256xf32> to vector<8xf32>
    %9 = vector.shape_cast %8 : vector<8xf32> to vector<8x1xf32>
    %cst_3 = arith.constant 2.550000e+02 : f32
    %10 = vector.broadcast %cst_3 : f32 to vector<8x1xf32>
    %11 = arith.divf %9, %10 : vector<8x1xf32>
    %12 = vector.broadcast %4 : vector<8x1xf32> to vector<8x256xf32>
    %13 = arith.subf %0, %12 : vector<8x256xf32>
    %14 = math.rsqrt %11 : vector<8x1xf32>
    %15 = vector.broadcast %14 : vector<8x1xf32> to vector<8x256xf32>
    %16 = arith.mulf %13, %15 : vector<8x256xf32>
    %c0_4 = arith.constant 0 : index
    %c0_5 = arith.constant 0 : index
    %17 = vector.load %arg2[%c0_4, %c0_5] : memref<8x1xf32, #tpu.memory_space<vmem>>, vector<8x1xf32>
    %18 = vector.broadcast %17 : vector<8x1xf32> to vector<8x256xf32>
    %19 = arith.addf %16, %18 : vector<8x256xf32>
    %20 = arith.negf %19 : vector<8x256xf32>
    %21 = math.exp %20 : vector<8x256xf32>
    %cst_6 = arith.constant 1.000000e+00 : f32
    %22 = vector.broadcast %cst_6 : f32 to vector<8x256xf32>
    %23 = arith.addf %22, %21 : vector<8x256xf32>
    %24 = arith.divf %22, %23 : vector<8x256xf32>
    %cst_7 = arith.constant dense<0.000000e+00> : vector<8xf32>
    %25 = vector.multi_reduction <add>, %24, %cst_7 [1] : vector<8x256xf32> to vector<8xf32>
    %26 = vector.shape_cast %25 : vector<8xf32> to vector<8x1xf32>
    %cst_8 = arith.constant 2.000000e+02 : f32
    %27 = vector.broadcast %cst_8 : f32 to vector<8x1xf32>
    %28 = arith.subf %26, %27 : vector<8x1xf32>
    %29 = arith.mulf %28, %28 : vector<8x1xf32>
    %cst_9 = arith.constant dense<0.000000e+00> : vector<1xf32>
    %30 = vector.multi_reduction <add>, %29, %cst_9 [0] : vector<8x1xf32> to vector<1xf32>
    %31 = vector.shape_cast %30 : vector<1xf32> to vector<1x1xf32>
    %cst_10 = arith.constant 8.000000e+00 : f32
    %32 = vector.broadcast %cst_10 : f32 to vector<1x1xf32>
    %33 = arith.divf %31, %32 : vector<1x1xf32>
    %c0_11 = arith.constant 0 : index
    %c0_12 = arith.constant 0 : index
    %34 = vector.load %arg10[%c0_11, %c0_12] : memref<1x1xf32, #tpu.memory_space<vmem>>, vector<1x1xf32>
    tpu.vector_store %arg10[%c0_11, %c0_12], %33 {strides = array<i32>} : memref<1x1xf32, #tpu.memory_space<vmem>>, vector<1x1xf32>,
    %c0_13 = arith.constant 0 : index
    %c0_14 = arith.constant 0 : index
    %35 = vector.load %arg3[%c0_13, %c0_14] : memref<8x256xf32, #tpu.memory_space<vmem>>, vector<8x256xf32>
    %36 = arith.cmpf oge, %24, %35 : vector<8x256xf32>
    %cst_15 = arith.constant 1.000000e+00 : f32
    %cst_16 = arith.constant 0.000000e+00 : f32
    %37 = vector.broadcast %cst_15 : f32 to vector<8x256xf32>
    %38 = vector.broadcast %cst_16 : f32 to vector<8x256xf32>
    %39 = arith.select %36, %37, %38 : vector<8x256xi1>, vector<8x256xf32>
    %c0_17 = arith.constant 0 : index
    %c0_18 = arith.constant 0 : index
    %40 = vector.load %arg0[%c0_17, %c0_18] : memref<8x256xf32, #tpu.memory_space<vmem>>, vector<8x256xf32>
    %41 = vector.shape_cast %40 : vector<8x256xf32> to vector<1x8x256xf32>
    %42 = vector.shape_cast %39 : vector<8x256xf32> to vector<8x1x256xf32>
    %43 = vector.broadcast %41 : vector<1x8x256xf32> to vector<8x8x256xf32>
    %44 = vector.broadcast %42 : vector<8x1x256xf32> to vector<8x8x256xf32>
    %45 = arith.mulf %43, %44 : vector<8x8x256xf32>
    %46 = arith.truncf %45 : vector<8x8x256xf32> to vector<8x8x256xbf16>
    %c0_19 = arith.constant 0 : index
    %c0_20 = arith.constant 0 : index
    %c0_21 = arith.constant 0 : index
    %47 = vector.load %arg5[%c0_19, %c0_20, %c0_21] : memref<8x256x32xbf16, #tpu.memory_space<vmem>>, vector<8x256x32xbf16>
    "tpu.trace_start"() <{level = 10 : i32, message = "obi,oih->obh"}> : () -> ()
    %cst_22 = arith.constant dense<0.000000e+00> : vector<8x8x32xf32>
    %48 = tpu.matmul %46, %47, %cst_22 {dimension_numbers = #tpu.dot_dimension_numbers<[2], [1], [1], [2], [0, 0, 0, 1, 1, 2], [0], [0]>} : vector<8x8x256xbf16>, vector<8x256x32xbf16>, vector<8x8x32xf32> -> vector<8x8x32xf32>
    "tpu.trace_stop"() : () -> ()
    %cst_23 = arith.constant 0.000000e+00 : f32
    %49 = vector.broadcast %cst_23 : f32 to vector<8x8x32xf32>
    %50 = arith.maximumf %48, %49 : vector<8x8x32xf32>
    %51 = arith.truncf %50 : vector<8x8x32xf32> to vector<8x8x32xbf16>
    %c0_24 = arith.constant 0 : index
    %c0_25 = arith.constant 0 : index
    %c0_26 = arith.constant 0 : index
    %52 = vector.load %arg6[%c0_24, %c0_25, %c0_26] : memref<8x32x32xbf16, #tpu.memory_space<vmem>>, vector<8x32x32xbf16>
    "tpu.trace_start"() <{level = 10 : i32, message = "obh,ohk->obk"}> : () -> ()
    %cst_27 = arith.constant dense<0.000000e+00> : vector<8x8x32xf32>
    %53 = tpu.matmul %51, %52, %cst_27 {dimension_numbers = #tpu.dot_dimension_numbers<[2], [1], [1], [2], [0, 0, 0, 1, 1, 2], [0], [0]>} : vector<8x8x32xbf16>, vector<8x32x32xbf16>, vector<8x8x32xf32> -> vector<8x8x32xf32>
    "tpu.trace_stop"() : () -> ()
    %cst_28 = arith.constant 0.000000e+00 : f32
    %54 = vector.broadcast %cst_28 : f32 to vector<8x8x32xf32>
    %55 = arith.maximumf %53, %54 : vector<8x8x32xf32>
    %56 = arith.truncf %55 : vector<8x8x32xf32> to vector<8x8x32xbf16>
    %c0_29 = arith.constant 0 : index
    %c0_30 = arith.constant 0 : index
    %c0_31 = arith.constant 0 : index
    %57 = vector.load %arg7[%c0_29, %c0_30, %c0_31] : memref<8x32x32xbf16, #tpu.memory_space<vmem>>, vector<8x32x32xbf16>
    "tpu.trace_start"() <{level = 10 : i32, message = "obh,ohk->obk"}> : () -> ()
    %cst_32 = arith.constant dense<0.000000e+00> : vector<8x8x32xf32>
    %58 = tpu.matmul %56, %57, %cst_32 {dimension_numbers = #tpu.dot_dimension_numbers<[2], [1], [1], [2], [0, 0, 0, 1, 1, 2], [0], [0]>} : vector<8x8x32xbf16>, vector<8x32x32xbf16>, vector<8x8x32xf32> -> vector<8x8x32xf32>
    "tpu.trace_stop"() : () -> ()
    %cst_33 = arith.constant 0.000000e+00 : f32
    %59 = vector.broadcast %cst_33 : f32 to vector<8x8x32xf32>
    %60 = arith.maximumf %58, %59 : vector<8x8x32xf32>
    %c0_34 = arith.constant 0 : index
    %c0_35 = arith.constant 0 : index
    %61 = vector.load %arg8[%c0_34, %c0_35] : memref<8x32xbf16, #tpu.memory_space<vmem>>, vector<8x32xbf16>
    %62 = arith.extf %61 : vector<8x32xbf16> to vector<8x32xf32>
    %63 = vector.shape_cast %62 : vector<8x32xf32> to vector<8x1x32xf32>
    %64 = vector.broadcast %63 : vector<8x1x32xf32> to vector<8x8x32xf32>
    %65 = arith.mulf %60, %64 : vector<8x8x32xf32>
    %cst_36 = arith.constant dense<0.000000e+00> : vector<8x8xf32>
    %66 = vector.multi_reduction <add>, %65, %cst_36 [2] : vector<8x8x32xf32> to vector<8x8xf32>
    %67 = tpu.transpose %66, [1, 0] : vector<8x8xf32> -> vector<8x8xf32>
    %68 = arith.negf %67 : vector<8x8xf32>
    %69 = math.exp %68 : vector<8x8xf32>
    %cst_37 = arith.constant 1.000000e+00 : f32
    %70 = vector.broadcast %cst_37 : f32 to vector<8x8xf32>
    %71 = arith.addf %70, %69 : vector<8x8xf32>
    %72 = arith.divf %70, %71 : vector<8x8xf32>
    %c0_38 = arith.constant 0 : index
    %c0_39 = arith.constant 0 : index
    %73 = vector.load %arg4[%c0_38, %c0_39] : memref<8x8xf32, #tpu.memory_space<vmem>>, vector<8x8xf32>
    %74 = arith.cmpf oge, %72, %73 : vector<8x8xf32>
    %cst_40 = arith.constant 1.000000e+00 : f32
    %cst_41 = arith.constant -1.000000e+00 : f32
    %75 = vector.broadcast %cst_40 : f32 to vector<8x8xf32>
    %76 = vector.broadcast %cst_41 : f32 to vector<8x8xf32>
    %77 = arith.select %74, %75, %76 : vector<8x8xi1>, vector<8x8xf32>
    %c0_42 = arith.constant 0 : index
    %c0_43 = arith.constant 0 : index
    %78 = vector.load %arg9[%c0_42, %c0_43] : memref<8x8xf32, #tpu.memory_space<vmem>>, vector<8x8xf32>
    tpu.vector_store %arg9[%c0_42, %c0_43], %77 {strides = array<i32>} : memref<8x8xf32, #tpu.memory_space<vmem>>, vector<8x8xf32>,
    return
  }
}

</mosaic_0001>

<bundles_post_ra>
// kernel: blayer_forward.3
= control target key start
LH: loop header
LB: loop body
LE: loop exit
PB: predicated region body
PF: predicated region fallthrough
CT: control target
= control target key end

     0   :  { %s3776_s0 = inlined_call_operand.vmem [shape: f32[8,256], index: 0, kind: input, shape index: {}]   ;;  %s3777_s1 = inlined_call_operand.vmem [shape: f32[8,256], index: 1, kind: input, shape index: {}]   ;;  %s3778_s2 = inlined_call_operand.vmem [shape: f32[8,1], index: 2, kind: input, shape index: {}]   ;;  %s3779_s3 = inlined_call_operand.vmem [shape: f32[8,256], index: 3, kind: input, shape index: {}]   ;;  %s3780_s4 = inlined_call_operand.vmem [shape: f32[8,8], index: 4, kind: input, shape index: {}]   ;;  %s3781_s5 = inlined_call_operand.vmem [shape: bf16[8,256,32], index: 5, kind: input, shape index: {}]   ;;  %s3782_s6 = inlined_call_operand.vmem [shape: bf16[8,32,32], index: 6, kind: input, shape index: {}]   ;;  %s3783_s7 = inlined_call_operand.vmem [shape: bf16[8,32,32], index: 7, kind: input, shape index: {}]   ;;  %s3784_s8 = inlined_call_operand.vmem [shape: bf16[8,32], index: 8, kind: input, shape index: {}]   ;;  %s3785_s9 = inlined_call_operand.vmem [shape: f32[8,8], index: 9, kind: output, shape index: {0}]   ;;  %s3786_s10 = inlined_call_operand.hbm [shape: f32[1,1], index: 10, kind: output, shape index: {1}]  }
   0x1   :  { %v36_v0 = vld [vmem:[%s3777_s1] sm:$0xff]  ;;  %v37_v1 = vld [vmem:[%s3777_s1 + $0x8] sm:$0xff] }
   0x2   :  { %16 = vsyncpa [#allocation3], 0  ;;  %v38_v2 = vadd.f32 %v37_v1, %v36_v0  ;;  %v3110_v3 = vmov 256.0   ;;  %v76_v4 = vld [vmem:[%s3778_s2] sm:$0xff]  ;;  %v3111_v5 = vmov 0   ;;  %v3112_v19 = vmov 255.0  }
   0x3   :  { %3064 = vrcp.f32 %v3110_v3  ;;  %3062 = vset.pattern.permute.xlu1 %v3111_v5  ;;  %v2902_v20 = vld [vmem:[%s3781_s5 + $0x38] sm:$0xff]  ;;  %v2901_v25 = vld [vmem:[%s3781_s5 + $0x30] sm:$0xff]  ;;  %v2900_v30 = vld [vmem:[%s3781_s5 + $0x28] sm:$0xff]  ;;  %vm154_vm15 = vcmask 1040384   ;;  %s2224_s1 = sshll.u32 %s3786_s10, 4  ;;  %s3115_s2 = smov [#allocation2]   ;;  %s2225_s1 = int_to_ptr.hbm [resolvable:$true] %s2224_s1 }
   0x4   :  { %39 = vadd.xlane.f32.xlu0 %v38_v2  ;;  %79 = vperm.xlu1 %3062, %v76_v4   ;;  %3066 = vrcp.f32 %v3112_v19  ;;  %v2910_v21 = vld [vmem:[%s3781_s5 + $0x78] sm:$0xff]  ;;  %v2909_v26 = vld [vmem:[%s3781_s5 + $0x70] sm:$0xff]  ;;  %v2908_v31 = vld [vmem:[%s3781_s5 + $0x68] sm:$0xff]  ;;  %s2222_s19 = sshll.u32 %s3115_s2, 4  ;;  %s2223_s19 = int_to_ptr.vmem [resolvable:$true] %s2222_s19 }
   0x5   :  { %592 = vmatpush.bf16.msra.mxu0 %v2902_v20  ;;  %605 = vmatpush.bf16.msra.mxu1 %v2910_v21  ;;  %v2918_v22 = vld [vmem:[%s3781_s5 + $0xb8] sm:$0xff]  ;;  %v2917_v28 = vld [vmem:[%s3781_s5 + $0xb0] sm:$0xff]  ;;  %v2916_v32 = vld [vmem:[%s3781_s5 + $0xa8] sm:$0xff] }
   0x6   :  { %v2926_v23 = vld [vmem:[%s3781_s5 + $0xf8] sm:$0xff]  ;;  %721 = vmatpush.bf16.msra.mxu2 %v2918_v22  ;;  %v2925_v29 = vld [vmem:[%s3781_s5 + $0xf0] sm:$0xff]  ;;  %v2924_v33 = vld [vmem:[%s3781_s5 + $0xe8] sm:$0xff] }
   0x7   :  { %734 = vmatpush.bf16.msra.mxu3 %v2926_v23  ;;  %v2899_v35 = vld [vmem:[%s3781_s5 + $0x20] sm:$0xff]  ;;  %v2898_v40 = vld [vmem:[%s3781_s5 + $0x18] sm:$0xff]  ;;  %v2897_v45 = vld [vmem:[%s3781_s5 + $0x10] sm:$0xff] }
   0x8   :  { %v2907_v36 = vld [vmem:[%s3781_s5 + $0x60] sm:$0xff]  ;;  %v2906_v41 = vld [vmem:[%s3781_s5 + $0x58] sm:$0xff]  ;;  %v2905_v46 = vld [vmem:[%s3781_s5 + $0x50] sm:$0xff] }
   0x9   :  { %v3065_v6 = vpop.eup %3064  ;;  %593 = vmatpush.bf16.msra.mxu0 %v2901_v25  ;;  %606 = vmatpush.bf16.msra.mxu1 %v2909_v26  ;;  %v2915_v38 = vld [vmem:[%s3781_s5 + $0xa0] sm:$0xff]  ;;  %v2914_v43 = vld [vmem:[%s3781_s5 + $0x98] sm:$0xff]  ;;  %v2913_v48 = vld [vmem:[%s3781_s5 + $0x90] sm:$0xff] }
   0xa   :  { %v42_v7 = vmul.f32 256.0, %v3065_v6  ;;  %vm46_vm0 = vweird.f32 %v3065_v6  ;;  %v3067_v24 = vpop.eup %3066  ;;  %722 = vmatpush.bf16.msra.mxu2 %v2917_v28  ;;  %v2923_v39 = vld [vmem:[%s3781_s5 + $0xe0] sm:$0xff]  ;;  %v2922_v44 = vld [vmem:[%s3781_s5 + $0xd8] sm:$0xff]  ;;  %v2921_v49 = vld [vmem:[%s3781_s5 + $0xd0] sm:$0xff] }
   0xb   :  { %v57_v27 = vmul.f32 255.0, %v3067_v24  ;;  %735 = vmatpush.bf16.msra.mxu3 %v2925_v29  ;;  %vm61_vm1 = vweird.f32 %v3067_v24  ;;  %v2896_v52 = vld [vmem:[%s3781_s5 + $0x8] sm:$0xff]  ;;  %v2895_v56 = vld [vmem:[%s3781_s5] sm:$0xff]  ;;  %v2934_v58 = vld [vmem:[%s3781_s5 + $0x138] sm:$0xff] }
   0xc   :  { %v43_v8 = vsub.f32 1.0, %v42_v7  ;;  %v2904_v53 = vld [vmem:[%s3781_s5 + $0x48] sm:$0xff]  ;;  %v2903_v57 = vld [vmem:[%s3781_s5 + $0x40] sm:$0xff]  ;;  %v2942_v59 = vld [vmem:[%s3781_s5 + $0x178] sm:$0xff] }
   0xd   :  { %v58_v34 = vsub.f32 1.0, %v57_v27  ;;  %594 = vmatpush.bf16.msra.mxu0 %v2900_v30  ;;  %607 = vmatpush.bf16.msra.mxu1 %v2908_v31  ;;  %v2912_v54 = vld [vmem:[%s3781_s5 + $0x88] sm:$0xff]  ;;  %v2911_v60 = vld [vmem:[%s3781_s5 + $0x80] sm:$0xff]  ;;  %v2950_v62 = vld [vmem:[%s3781_s5 + $0x1b8] sm:$0xff] }
   0xe   :  { %v44_v9 = vmul.f32 %v3065_v6, %v43_v8  ;;  %723 = vmatpush.bf16.msra.mxu2 %v2916_v32  ;;  %v2920_v55 = vld [vmem:[%s3781_s5 + $0xc8] sm:$0xff]  ;;  %v2919_v61 = vld [vmem:[%s3781_s5 + $0xc0] sm:$0xff]  ;;  %v2958_v63 = vld [vmem:[%s3781_s5 + $0x1f8] sm:$0xff] }
   0xf   :  { %736 = vmatpush.bf16.msra.mxu3 %v2924_v33  ;;  %v59_v37 = vmul.f32 %v3067_v24, %v58_v34  ;;  %v2933_v2 = vld [vmem:[%s3781_s5 + $0x130] sm:$0xff]  ;;  %v2947_v21 = vld [vmem:[%s3781_s5 + $0x1a0] sm:$0xff]  ;;  %v2930_v25 = vld [vmem:[%s3781_s5 + $0x118] sm:$0xff] }
  0x10   :  { %v45_v10 = vadd.f32 %v3065_v6, %v44_v9  ;;  %v2941_v3 = vld [vmem:[%s3781_s5 + $0x170] sm:$0xff]  ;;  %v2932_v9 = vld [vmem:[%s3781_s5 + $0x128] sm:$0xff]  ;;  %v2955_v22 = vld [vmem:[%s3781_s5 + $0x1e0] sm:$0xff] }
  0x11   :  { %595 = vmatpush.bf16.msra.mxu0 %v2899_v35  ;;  %608 = vmatpush.bf16.msra.mxu1 %v2907_v36  ;;  %v60_v42 = vadd.f32 %v3067_v24, %v59_v37  ;;  %v2957_v7 = vld [vmem:[%s3781_s5 + $0x1f0] sm:$0xff]  ;;  %v2938_v26 = vld [vmem:[%s3781_s5 + $0x158] sm:$0xff]  ;;  %v2928_v35 = vld [vmem:[%s3781_s5 + $0x108] sm:$0xff] }
  0x12   :  { %v47_v11 = vsel %vm46_vm0, %v3065_v6, %v45_v10  ;;  %724 = vmatpush.bf16.msra.mxu2 %v2915_v38  ;;  %v2949_v6 = vld [vmem:[%s3781_s5 + $0x1b0] sm:$0xff]  ;;  %v2940_v10 = vld [vmem:[%s3781_s5 + $0x168] sm:$0xff]  ;;  %vm156_vm0 = vcmask 1041409  }
  0x13   :  { %737 = vmatpush.bf16.msra.mxu3 %v2923_v39  ;;  %v62_v47 = vsel %vm61_vm1, %v3067_v24, %v60_v42  ;;  %v2929_v29 = vld [vmem:[%s3781_s5 + $0x110] sm:$0xff]  ;;  %v2936_v36 = vld [vmem:[%s3781_s5 + $0x148] sm:$0xff]  ;;  %v2927_v39 = vld [vmem:[%s3781_s5 + $0x100] sm:$0xff]  ;;  %vm159_vm1 = vcmask 1042434  }
  0x14   :  { %v2937_v32 = vld [vmem:[%s3781_s5 + $0x150] sm:$0xff]  ;;  %v2944_v37 = vld [vmem:[%s3781_s5 + $0x188] sm:$0xff] }
  0x15   :  { %596 = vmatpush.bf16.msra.mxu0 %v2898_v40  ;;  %609 = vmatpush.bf16.msra.mxu1 %v2906_v41  ;;  %v2945_v33 = vld [vmem:[%s3781_s5 + $0x190] sm:$0xff]  ;;  %v2952_v38 = vld [vmem:[%s3781_s5 + $0x1c8] sm:$0xff]  ;;  %v2935_v40 = vld [vmem:[%s3781_s5 + $0x140] sm:$0xff] }
  0x16   :  { %725 = vmatpush.bf16.msra.mxu2 %v2914_v43  ;;  %v2953_v34 = vld [vmem:[%s3781_s5 + $0x1d0] sm:$0xff] }
  0x17   :  { %738 = vmatpush.bf16.msra.mxu3 %v2922_v44 }
  0x19   :  { %597 = vmatpush.bf16.msra.mxu0 %v2897_v45  ;;  %610 = vmatpush.bf16.msra.mxu1 %v2905_v46  ;;  %v2943_v45 = vld [vmem:[%s3781_s5 + $0x180] sm:$0xff] }
  0x1a   :  { %726 = vmatpush.bf16.msra.mxu2 %v2913_v48  ;;  %v2951_v46 = vld [vmem:[%s3781_s5 + $0x1c0] sm:$0xff] }
  0x1b   :  { %739 = vmatpush.bf16.msra.mxu3 %v2921_v49 }
  0x1d   :  { %598 = vmatpush.bf16.msra.mxu0 %v2896_v52  ;;  %611 = vmatpush.bf16.msra.mxu1 %v2904_v53 }
  0x1e   :  { %727 = vmatpush.bf16.msra.mxu2 %v2912_v54 }
  0x1f   :  { %740 = vmatpush.bf16.msra.mxu3 %v2920_v55 }
  0x21   :  { %599 = vmatpush.bf16.msra.mxu0 %v2895_v56  ;;  %612 = vmatpush.bf16.msra.mxu1 %v2903_v57 }
  0x22   :  { %728 = vmatpush.bf16.msra.mxu2 %v2911_v60 }
  0x23   :  { %741 = vmatpush.bf16.msra.mxu3 %v2919_v61 }
  0x25   :  { %850 = vmatpush.bf16.msrb.mxu0 %v2934_v58  ;;  %863 = vmatpush.bf16.msrb.mxu1 %v2942_v59 }
  0x26   :  { %979 = vmatpush.bf16.msrb.mxu2 %v2950_v62  ;;  %v143_v62 = vld [vmem:[%s3779_s3] sm:$0xff] }
  0x27   :  { %992 = vmatpush.bf16.msrb.mxu3 %v2958_v63  ;;  %v144_v63 = vld [vmem:[%s3779_s3 + $0x8] sm:$0xff] }
  0x29   :  { %851 = vmatpush.bf16.msrb.mxu0 %v2933_v2  ;;  %864 = vmatpush.bf16.msrb.mxu1 %v2941_v3 }
  0x2a   :  { %980 = vmatpush.bf16.msrb.mxu2 %v2949_v6 }
  0x2b   :  { %993 = vmatpush.bf16.msrb.mxu3 %v2957_v7  ;;  %v3113_v7 = vmov 0.0  }
  0x2d   :  { %852 = vmatpush.bf16.msrb.mxu0 %v2932_v9  ;;  %865 = vmatpush.bf16.msrb.mxu1 %v2940_v10 }
  0x76   :  { %v80_v19 = vpop.permute.xlu1 %79 }
  0x77   :  { %v40_v12 = vpop.xlane.xlu0 %39 }
  0x78   :  { %v48_v13 = vmul.f32 %v47_v11, %v40_v12  ;;  %v2948_v12 = vld [vmem:[%s3781_s5 + $0x1a8] sm:$0xff] }
  0x79   :  { %981 = vmatpush.bf16.msrb.mxu2 %v2948_v12  ;;  %v3404_v12 = vld [vmem:[%s3776_s0 + $0x8] sm:$0xff] }
  0x7a   :  { %v3182_v14 = vsub.f32 %v36_v0, %v48_v13  ;;  %v3184_v15 = vsub.f32 %v37_v1, %v48_v13  ;;  %v2956_v13 = vld [vmem:[%s3781_s5 + $0x1e8] sm:$0xff] }
  0x7b   :  { %994 = vmatpush.bf16.msrb.mxu3 %v2956_v13 }
  0x7c   :  { %v51_v16 = vmul.f32 %v3182_v14, %v3182_v14  ;;  %v52_v17 = vmul.f32 %v3184_v15, %v3184_v15 }
  0x7d   :  { %982 = vmatpush.bf16.msrb.mxu2 %v2947_v21 }
  0x7e   :  { %v53_v18 = vadd.f32 %v52_v17, %v51_v16  ;;  %v2931_v17 = vld [vmem:[%s3781_s5 + $0x120] sm:$0xff] }
  0x7f   :  { %853 = vmatpush.bf16.msrb.mxu0 %v2931_v17  ;;  %995 = vmatpush.bf16.msrb.mxu3 %v2955_v22 }
  0x80   :  { %54 = vadd.xlane.f32.xlu0 %v53_v18  ;;  %v2939_v18 = vld [vmem:[%s3781_s5 + $0x160] sm:$0xff] }
  0x81   :  { %866 = vmatpush.bf16.msrb.mxu1 %v2939_v18 }
  0x83   :  { %854 = vmatpush.bf16.msrb.mxu0 %v2930_v25 }
  0x85   :  { %867 = vmatpush.bf16.msrb.mxu1 %v2938_v26 }
  0x87   :  { %855 = vmatpush.bf16.msrb.mxu0 %v2929_v29 }
  0x89   :  { %868 = vmatpush.bf16.msrb.mxu1 %v2937_v32  ;;  %v2966_v32 = vld [vmem:[%s3781_s5 + $0x238] sm:$0xff] }
  0x8b   :  { %856 = vmatpush.bf16.msrb.mxu0 %v2928_v35 }
  0x8d   :  { %869 = vmatpush.bf16.msrb.mxu1 %v2936_v36 }
  0x8f   :  { %857 = vmatpush.bf16.msrb.mxu0 %v2927_v39 }
  0x91   :  { %870 = vmatpush.bf16.msrb.mxu1 %v2935_v40  ;;  %v2982_v40 = vld [vmem:[%s3781_s5 + $0x2b8] sm:$0xff] }
  0xf3   :  { %v55_v50 = vpop.xlane.xlu0 %54 }
  0xf4   :  { %v63_v51 = vmul.f32 %v62_v47, %v55_v50 }
  0xf6   :  { %3068 = vrsqrt.f32 %v63_v51  ;;  %vm70_vm3 = vweird.f32 %v63_v51 }
  0xfc   :  { %v3069_v0 = vpop.eup %3068 }
  0xfd   :  { %v65_v1 = vmul.f32 %v3069_v0, %v63_v51  ;;  %vm71_vm2 = vweird.f32 %v3069_v0 }
  0xfe   :  { %vm72_vm4 = vmor %vm70_vm3, %vm71_vm2  ;;  %vm162_vm2 = vcmask 1043459   ;;  %vm165_vm3 = vcmask 1044484  }
  0xff   :  { %v66_v4 = vmul.f32 %v3069_v0, %v65_v1 }
 0x101   :  { %v67_v8 = vmul.f32 0.5, %v66_v4 }
 0x103   :  { %v68_v11 = vsub.f32 1.5, %v67_v8 }
 0x105   :  { %v69_v16 = vmul.f32 %v3069_v0, %v68_v11  ;;  %v3399_v11 = vld [vmem:[%s3776_s0] sm:$0xff] }
 0x107   :  { %v73_v20 = vsel %vm72_vm4, %v3069_v0, %v69_v16  ;;  %vm168_vm4 = vcmask 1045509  }
 0x108   :  { %v74_v23 = vmul.f32 %v73_v20, %v3182_v14  ;;  %v75_v24 = vmul.f32 %v73_v20, %v3184_v15  ;;  %v2946_v14 = vld [vmem:[%s3781_s5 + $0x198] sm:$0xff] }
 0x109   :  { %v2954_v15 = vld [vmem:[%s3781_s5 + $0x1d8] sm:$0xff]  ;;  %983 = vmatpush.bf16.msrb.mxu2 %v2946_v14 }
 0x10a   :  { %v82_v27 = vadd.f32 %v80_v19, %v74_v23  ;;  %v83_v28 = vadd.f32 %v80_v19, %v75_v24  ;;  %996 = vmatpush.bf16.msrb.mxu3 %v2954_v15 }
 0x10c   :  { %v2235_v30 = vmul.f32 -1.442695, %v82_v27  ;;  %v2236_v31 = vmul.f32 -1.442695, %v83_v28 }
 0x10d   :  { %984 = vmatpush.bf16.msrb.mxu2 %v2945_v33  ;;  %v2974_v33 = vld [vmem:[%s3781_s5 + $0x278] sm:$0xff] }
 0x10e   :  { %3070 = vpow2.f32 %v2235_v30  ;;  %997 = vmatpush.bf16.msrb.mxu3 %v2953_v34 }
 0x10f   :  { %3072 = vpow2.f32 %v2236_v31 }
 0x111   :  { %985 = vmatpush.bf16.msrb.mxu2 %v2944_v37 }
 0x112   :  { %998 = vmatpush.bf16.msrb.mxu3 %v2952_v38 }
 0x114   :  { %v3071_v41 = vpop.eup %3070 }
 0x115   :  { %v3073_v42 = vpop.eup %3072  ;;  %v90_v43 = vadd.f32 1.0, %v3071_v41  ;;  %986 = vmatpush.bf16.msrb.mxu2 %v2943_v45  ;;  %v2990_v41 = vld [vmem:[%s3781_s5 + $0x2f8] sm:$0xff] }
 0x116   :  { %v91_v44 = vadd.f32 1.0, %v3073_v42  ;;  %999 = vmatpush.bf16.msrb.mxu3 %v2951_v46  ;;  %v2965_v46 = vld [vmem:[%s3781_s5 + $0x230] sm:$0xff] }
 0x117   :  { %3074 = vrcp.f32 %v90_v43  ;;  %v103_v52 = vand.u32 2147483648, %v90_v43  ;;  %v101_v55 = vand.u32 2147483647, %v90_v43  ;;  %vm97_vm7 = vweird.f32 %v90_v43 }
 0x118   :  { %3076 = vrcp.f32 %v91_v44  ;;  %v118_v56 = vand.u32 2147483648, %v91_v44  ;;  %v116_v58 = vand.u32 2147483647, %v91_v44  ;;  %vm112_vm9 = vweird.f32 %v91_v44 }
 0x119   :  { %v104_v60 = vor.u32 1.1754944e-38, %v103_v52  ;;  %vm102_vm10 = vcmp.eq.f32.partialorder %v101_v55, 8.507059e+37  ;;  %v2972_v55 = vld [vmem:[%s3781_s5 + $0x268] sm:$0xff] }
 0x11a   :  { %v119_v1 = vor.u32 1.1754944e-38, %v118_v56  ;;  %vm117_vm12 = vcmp.eq.f32.partialorder %v116_v58, 8.507059e+37  ;;  %v2988_v58 = vld [vmem:[%s3781_s5 + $0x2e8] sm:$0xff] }
 0x11d   :  { %v3075_v47 = vpop.eup %3074 }
 0x11e   :  { %v3077_v48 = vpop.eup %3076  ;;  %v93_v49 = vmul.f32 %v3075_v47, %v90_v43  ;;  %vm98_vm5 = vweird.f32 %v3075_v47 }
 0x11f   :  { %v108_v50 = vmul.f32 %v3077_v48, %v91_v44  ;;  %vm113_vm6 = vweird.f32 %v3077_v48  ;;  %vm99_vm8 = vmor %vm97_vm7, %vm98_vm5  ;;  %vm171_vm5 = vcmask 1046534   ;;  %vm1581_vm7 = vcmask 261120  }
 0x120   :  { %v94_v51 = vsub.f32 1.0, %v93_v49  ;;  %vm114_vm11 = vmor %vm112_vm9, %vm113_vm6  ;;  %vm174_vm6 = vcmask 1046528  }
 0x121   :  { %v109_v53 = vsub.f32 1.0, %v108_v50  ;;  %v2981_v50 = vld [vmem:[%s3781_s5 + $0x2b0] sm:$0xff] }
 0x122   :  { %v95_v54 = vmul.f32 %v3075_v47, %v94_v51  ;;  %v2989_v51 = vld [vmem:[%s3781_s5 + $0x2f0] sm:$0xff] }
 0x123   :  { %v110_v57 = vmul.f32 %v3077_v48, %v109_v53 }
 0x124   :  { %v96_v59 = vadd.f32 %v3075_v47, %v95_v54  ;;  %v2964_v54 = vld [vmem:[%s3781_s5 + $0x228] sm:$0xff] }
 0x125   :  { %v111_v61 = vadd.f32 %v3077_v48, %v110_v57  ;;  %v2980_v57 = vld [vmem:[%s3781_s5 + $0x2a8] sm:$0xff] }
 0x126   :  { %v100_v0 = vsel %vm99_vm8, %v3075_v47, %v96_v59  ;;  %v2973_v47 = vld [vmem:[%s3781_s5 + $0x270] sm:$0xff]  ;;  %vm2156_vm8 = vcmask 1047559  }
 0x127   :  { %v105_v2 = vsel %vm102_vm10, %v104_v60, %v100_v0  ;;  %v115_v3 = vsel %vm114_vm11, %v3077_v48, %v111_v61  ;;  %v2963_v61 = vld [vmem:[%s3781_s5 + $0x220] sm:$0xff]  ;;  %vm141_vm10 = vcmask 0  }
 0x128   :  { %v120_v4 = vsel %vm117_vm12, %v119_v1, %v115_v3  ;;  %vm145_vm13 = vcmp.ge.f32.partialorder %v105_v2, %v143_v62  ;;  %v2971_v62 = vld [vmem:[%s3781_s5 + $0x260] sm:$0xff] }
 0x129   :  { %vm146_vm14 = vcmp.ge.f32.partialorder %v120_v4, %v144_v63  ;;  %v3390_v6 = vadd.f32 %v120_v4, %v105_v2  ;;  %v3394_v10 = vsel %vm145_vm13, 1.0, %v3113_v7  ;;  %v2979_v2 = vld [vmem:[%s3781_s5 + $0x2a0] sm:$0xff] }
 0x12a   :  { %v148_v8 = vsel %vm146_vm14, 1.0, %v3113_v7  ;;  %v2987_v3 = vld [vmem:[%s3781_s5 + $0x2e0] sm:$0xff] }
 0x12b   :  { %v3392_v9 = vrot.slane %v148_v8, 7 }
 0x12d   :  { %v155_v13 = vsel %vm154_vm15, %v3394_v10, %v3392_v9  ;;  %v157_v16 = vsel %vm156_vm0, %v3394_v10, %v3392_v9  ;;  %v160_v20 = vsel %vm159_vm1, %v3394_v10, %v3392_v9  ;;  %v163_v26 = vsel %vm162_vm2, %v3394_v10, %v3392_v9 }
 0x12e   :  { %v177_v17 = vperm.slane %v155_v13, 0  ;;  %v178_v18 = vperm.slane %v155_v13, 1  ;;  %v158_v19 = vrot.slane %v157_v16, 1  ;;  %v161_v25 = vrot.slane %v160_v20, 2  ;;  %v2962_v13 = vld [vmem:[%s3781_s5 + $0x218] sm:$0xff] }
 0x12f   :  { %v164_v31 = vrot.slane %v163_v26, 3  ;;  %v166_v60 = vsel %vm165_vm3, %v3394_v10, %v3392_v9  ;;  %v169_v1 = vsel %vm168_vm4, %v3394_v10, %v3392_v9  ;;  %v2970_v16 = vld [vmem:[%s3781_s5 + $0x258] sm:$0xff]  ;;  %v2961_v26 = vld [vmem:[%s3781_s5 + $0x210] sm:$0xff]  ;;  %vm2213_vm15 = vcmask 64512  }
 0x130   :  { %v209_v21 = vmul.f32 %v177_v17, %v3399_v11  ;;  %v210_v22 = vmul.f32 %v178_v18, %v3404_v12  ;;  %v179_v23 = vperm.slane %v158_v19, 0  ;;  %v180_v24 = vperm.slane %v158_v19, 1  ;;  %v2978_v20 = vld [vmem:[%s3781_s5 + $0x298] sm:$0xff] }
 0x131   :  { %v181_v34 = vperm.slane %v161_v25, 0  ;;  %v182_v35 = vperm.slane %v161_v25, 1  ;;  %v183_v44 = vperm.slane %v164_v31, 0  ;;  %v184_v45 = vperm.slane %v164_v31, 1 }
 0x132   :  { %v225_v27 = vpack.c.bf16 %v210_v22, %v209_v21  ;;  %v211_v28 = vmul.f32 %v179_v23, %v3399_v11  ;;  %v212_v14 = vmul.f32 %v180_v24, %v3404_v12  ;;  %v167_v4 = vrot.slane %v166_v60, 4  ;;  %v2986_v21 = vld [vmem:[%s3781_s5 + $0x2d8] sm:$0xff]  ;;  %v2996_v60 = vld [vmem:[%s3781_s5 + $0x328] sm:$0xff] }
 0x133   :  { %v213_v48 = vmul.f32 %v181_v34, %v3399_v11  ;;  %v214_v49 = vmul.f32 %v182_v35, %v3404_v12  ;;  %v215_v52 = vmul.f32 %v183_v44, %v3399_v11  ;;  %v216_v53 = vmul.f32 %v184_v45, %v3404_v12  ;;  %v2975_v44 = vld [vmem:[%s3781_s5 + $0x280] sm:$0xff] }
 0x134   :  { %v490_v15 = vunpack.c.l.b16 %v225_v27  ;;  %v491_v29 = vunpack.c.h.b16 %v225_v27  ;;  %v226_v30 = vpack.c.bf16 %v212_v14, %v211_v28  ;;  %v170_v17 = vrot.slane %v169_v1, 5  ;;  %v2969_v27 = vld [vmem:[%s3781_s5 + $0x250] sm:$0xff]  ;;  %v2983_v45 = vld [vmem:[%s3781_s5 + $0x2c0] sm:$0xff] }
 0x135   :  { %v227_v56 = vpack.c.bf16 %v214_v49, %v213_v48  ;;  %v228_v59 = vpack.c.bf16 %v216_v53, %v215_v52  ;;  %v185_v22 = vperm.slane %v167_v4, 0  ;;  %v186_v23 = vperm.slane %v167_v4, 1  ;;  %v3014_v48 = vld [vmem:[%s3781_s5 + $0x3b8] sm:$0xff]  ;;  %v2997_v52 = vld [vmem:[%s3781_s5 + $0x330] sm:$0xff]  ;;  %v2995_v1 = vld [vmem:[%s3781_s5 + $0x320] sm:$0xff] }
 0x136   :  { %v492_v36 = vpack.c.b16 %v490_v15, %v490_v15  ;;  %v493_v37 = vpack.c.b16 %v491_v29, %v491_v29  ;;  %v619_v38 = vunpack.c.l.b16 %v226_v30  ;;  %v620_v39 = vunpack.c.h.b16 %v226_v30  ;;  %v2977_v15 = vld [vmem:[%s3781_s5 + $0x290] sm:$0xff]  ;;  %v3022_v49 = vld [vmem:[%s3781_s5 + $0x3f8] sm:$0xff] }
 0x137   :  { %v748_v63 = vunpack.c.l.b16 %v227_v56  ;;  %v749_v0 = vunpack.c.h.b16 %v227_v56  ;;  %v877_v7 = vunpack.c.l.b16 %v228_v59  ;;  %v878_v8 = vunpack.c.h.b16 %v228_v59  ;;  %v2985_v29 = vld [vmem:[%s3781_s5 + $0x2d0] sm:$0xff] }
 0x138   :  { %600 = vmatmul.bf16.vlgmr.msra.gmra.mxu0 %v492_v36  ;;  %613 = vmatmul.bf16.vlgmr.msra.gmra.mxu1 %v493_v37  ;;  %v621_v42 = vpack.c.b16 %v619_v38, %v619_v38  ;;  %v622_v43 = vpack.c.b16 %v620_v39, %v620_v39  ;;  %v187_v28 = vperm.slane %v170_v17, 0  ;;  %v188_v14 = vperm.slane %v170_v17, 1  ;;  %v2976_v36 = vld [vmem:[%s3781_s5 + $0x288] sm:$0xff]  ;;  %v2959_v39 = vld [vmem:[%s3781_s5 + $0x200] sm:$0xff]  ;;  %v3005_v53 = vld [vmem:[%s3781_s5 + $0x370] sm:$0xff] }
 0x139   :  { %1108 = vmatpush.bf16.msra.mxu0 %v2966_v32  ;;  %1121 = vmatpush.bf16.msra.mxu1 %v2974_v33  ;;  %v750_v18 = vpack.c.b16 %v748_v63, %v748_v63  ;;  %v751_v19 = vpack.c.b16 %v749_v0, %v749_v0  ;;  %v879_v24 = vpack.c.b16 %v877_v7, %v877_v7  ;;  %v2960_v32 = vld [vmem:[%s3781_s5 + $0x208] sm:$0xff]  ;;  %v3013_v56 = vld [vmem:[%s3781_s5 + $0x3b0] sm:$0xff]  ;;  %v3011_v7 = vld [vmem:[%s3781_s5 + $0x3a0] sm:$0xff] }
 0x13a   :  { %729 = vmatmul.bf16.vlgmr.msra.gmra.mxu2 %v621_v42  ;;  %742 = vmatmul.bf16.vlgmr.msra.gmra.mxu3 %v622_v43  ;;  %v880_v25 = vpack.c.b16 %v878_v8, %v878_v8  ;;  %v217_v30 = vmul.f32 %v185_v22, %v3399_v11  ;;  %v218_v31 = vmul.f32 %v186_v23, %v3404_v12  ;;  %v2968_v33 = vld [vmem:[%s3781_s5 + $0x248] sm:$0xff]  ;;  %v2998_v42 = vld [vmem:[%s3781_s5 + $0x338] sm:$0xff]  ;;  %v3019_v8 = vld [vmem:[%s3781_s5 + $0x3e0] sm:$0xff] }
 0x13b   :  { %1237 = vmatpush.bf16.msra.mxu2 %v2982_v40  ;;  %1250 = vmatpush.bf16.msra.mxu3 %v2990_v41  ;;  %v219_v34 = vmul.f32 %v187_v28, %v3399_v11  ;;  %v220_v35 = vmul.f32 %v188_v14, %v3404_v12  ;;  %v2984_v37 = vld [vmem:[%s3781_s5 + $0x2c8] sm:$0xff]  ;;  %v2967_v40 = vld [vmem:[%s3781_s5 + $0x240] sm:$0xff]  ;;  %v3006_v43 = vld [vmem:[%s3781_s5 + $0x378] sm:$0xff]  ;;  %v172_v0 = vsel %vm171_vm5, %v3394_v10, %v3392_v9 }
 0x13c   :  { %v229_v38 = vpack.c.bf16 %v218_v31, %v217_v30  ;;  %v3020_v63 = vld [vmem:[%s3781_s5 + $0x3e8] sm:$0xff]  ;;  %v173_v4 = vrot.slane %v172_v0, 6  ;;  %v2993_v22 = vld [vmem:[%s3781_s5 + $0x310] sm:$0xff] }
 0x13d   :  { %1109 = vmatpush.bf16.msra.mxu0 %v2965_v46  ;;  %1122 = vmatpush.bf16.msra.mxu1 %v2973_v47  ;;  %v230_v41 = vpack.c.bf16 %v220_v35, %v219_v34  ;;  %v3001_v23 = vld [vmem:[%s3781_s5 + $0x350] sm:$0xff]  ;;  %v3008_v31 = vld [vmem:[%s3781_s5 + $0x388] sm:$0xff] }
 0x13e   :  { %v1006_v46 = vunpack.c.l.b16 %v229_v38  ;;  %v1007_v47 = vunpack.c.h.b16 %v229_v38  ;;  %v190_v17 = vperm.slane %v173_v4, 1 }
 0x13f   :  { %1238 = vmatpush.bf16.msra.mxu2 %v2981_v50  ;;  %1251 = vmatpush.bf16.msra.mxu3 %v2989_v51  ;;  %v1135_v50 = vunpack.c.l.b16 %v230_v41  ;;  %v1136_v51 = vunpack.c.h.b16 %v230_v41 }
 0x141   :  { %1110 = vmatpush.bf16.msra.mxu0 %v2964_v54  ;;  %1123 = vmatpush.bf16.msra.mxu1 %v2972_v55  ;;  %v1008_v54 = vpack.c.b16 %v1006_v46, %v1006_v46  ;;  %v1009_v55 = vpack.c.b16 %v1007_v47, %v1007_v47  ;;  %v1138_v59 = vpack.c.b16 %v1136_v51, %v1136_v51  ;;  %v3026_v46 = vld [vmem:[%s3782_s6 + $0x18] sm:$0xff]  ;;  %v3025_v47 = vld [vmem:[%s3782_s6 + $0x10] sm:$0xff] }
 0x143   :  { %1239 = vmatpush.bf16.msra.mxu2 %v2980_v57  ;;  %1252 = vmatpush.bf16.msra.mxu3 %v2988_v58  ;;  %v3021_v57 = vld [vmem:[%s3781_s5 + $0x3f0] sm:$0xff]  ;;  %v1137_v58 = vpack.c.b16 %v1135_v50, %v1135_v50  ;;  %v3030_v50 = vld [vmem:[%s3782_s6 + $0x38] sm:$0xff] }
 0x145   :  { %1111 = vmatpush.bf16.msra.mxu0 %v2963_v61  ;;  %1124 = vmatpush.bf16.msra.mxu1 %v2971_v62  ;;  %v3004_v61 = vld [vmem:[%s3781_s5 + $0x368] sm:$0xff] }
 0x146   :  { %v3012_v62 = vld [vmem:[%s3781_s5 + $0x3a8] sm:$0xff] }
 0x147   :  { %1240 = vmatpush.bf16.msra.mxu2 %v2979_v2  ;;  %1253 = vmatpush.bf16.msra.mxu3 %v2987_v3  ;;  %v3003_v2 = vld [vmem:[%s3781_s5 + $0x360] sm:$0xff]  ;;  %v175_v3 = vsel %vm174_vm6, %v3392_v9, %v3394_v10  ;;  %v3002_v9 = vld [vmem:[%s3781_s5 + $0x358] sm:$0xff]  ;;  %v189_v10 = vperm.slane %v173_v4, 0 }
 0x148   :  { %858 = vmatmul.bf16.vlgmr.msrb.gmra.mxu0 %v750_v18  ;;  %871 = vmatmul.bf16.vlgmr.msrb.gmra.mxu1 %v751_v19  ;;  %v3010_v18 = vld [vmem:[%s3781_s5 + $0x398] sm:$0xff] }
 0x149   :  { %1112 = vmatpush.bf16.msra.mxu0 %v2962_v13  ;;  %1125 = vmatpush.bf16.msra.mxu1 %v2970_v16  ;;  %v176_v13 = vrot.slane %v175_v3, 7  ;;  %v2994_v16 = vld [vmem:[%s3781_s5 + $0x318] sm:$0xff] }
 0x14a   :  { %987 = vmatmul.bf16.vlgmr.msrb.gmra.mxu2 %v879_v24  ;;  %1000 = vmatmul.bf16.vlgmr.msrb.gmra.mxu3 %v880_v25  ;;  %v3018_v19 = vld [vmem:[%s3781_s5 + $0x3d8] sm:$0xff]  ;;  %v221_v24 = vmul.f32 %v189_v10, %v3399_v11  ;;  %v222_v25 = vmul.f32 %v190_v17, %v3404_v12 }
 0x14b   :  { %1241 = vmatpush.bf16.msra.mxu2 %v2978_v20  ;;  %1254 = vmatpush.bf16.msra.mxu3 %v2986_v21  ;;  %v191_v20 = vperm.slane %v176_v13, 0  ;;  %v192_v21 = vperm.slane %v176_v13, 1  ;;  %v3038_v10 = vld [vmem:[%s3782_s6 + $0x78] sm:$0xff] }
 0x14c   :  { %v231_v30 = vpack.c.bf16 %v222_v25, %v221_v24 }
 0x14d   :  { %1113 = vmatpush.bf16.msra.mxu0 %v2961_v26  ;;  %1126 = vmatpush.bf16.msra.mxu1 %v2969_v27  ;;  %v3009_v26 = vld [vmem:[%s3781_s5 + $0x390] sm:$0xff]  ;;  %v223_v28 = vmul.f32 %v191_v20, %v3399_v11  ;;  %v224_v14 = vmul.f32 %v192_v21, %v3404_v12  ;;  %v3016_v11 = vld [vmem:[%s3781_s5 + $0x3c8] sm:$0xff] }
 0x14e   :  { %v3017_v27 = vld [vmem:[%s3781_s5 + $0x3d0] sm:$0xff]  ;;  %v1264_v34 = vunpack.c.l.b16 %v231_v30  ;;  %v1265_v35 = vunpack.c.h.b16 %v231_v30 }
 0x14f   :  { %1242 = vmatpush.bf16.msra.mxu2 %v2977_v15  ;;  %1255 = vmatpush.bf16.msra.mxu3 %v2985_v29  ;;  %v2992_v15 = vld [vmem:[%s3781_s5 + $0x308] sm:$0xff]  ;;  %v232_v12 = vpack.c.bf16 %v224_v14, %v223_v28  ;;  %v3037_v30 = vld [vmem:[%s3782_s6 + $0x70] sm:$0xff] }
 0x150   :  { %v3000_v29 = vld [vmem:[%s3781_s5 + $0x348] sm:$0xff]  ;;  %v1267_v41 = vpack.c.b16 %v1265_v35, %v1265_v35 }
 0x151   :  { %1114 = vmatpush.bf16.msra.mxu0 %v2960_v32  ;;  %1127 = vmatpush.bf16.msra.mxu1 %v2968_v33  ;;  %v2991_v32 = vld [vmem:[%s3781_s5 + $0x300] sm:$0xff]  ;;  %v1393_v38 = vunpack.c.l.b16 %v232_v12 }
 0x152   :  { %v2999_v33 = vld [vmem:[%s3781_s5 + $0x340] sm:$0xff] }
 0x153   :  { %1243 = vmatpush.bf16.msra.mxu2 %v2976_v36  ;;  %1256 = vmatpush.bf16.msra.mxu3 %v2984_v37  ;;  %v3007_v36 = vld [vmem:[%s3781_s5 + $0x380] sm:$0xff] }
 0x154   :  { %v3015_v37 = vld [vmem:[%s3781_s5 + $0x3c0] sm:$0xff] }
 0x155   :  { %1115 = vmatpush.bf16.msra.mxu0 %v2959_v39  ;;  %1128 = vmatpush.bf16.msra.mxu1 %v2967_v40  ;;  %v1394_v39 = vunpack.c.h.b16 %v232_v12  ;;  %v1266_v40 = vpack.c.b16 %v1264_v34, %v1264_v34 }
 0x157   :  { %1244 = vmatpush.bf16.msra.mxu2 %v2975_v44  ;;  %1257 = vmatpush.bf16.msra.mxu3 %v2983_v45  ;;  %v3024_v44 = vld [vmem:[%s3782_s6 + $0x8] sm:$0xff]  ;;  %v3023_v45 = vld [vmem:[%s3782_s6] sm:$0xff] }
 0x158   :  { %1116 = vmatmul.bf16.vlgmr.msra.gmra.mxu0 %v1008_v54  ;;  %1129 = vmatmul.bf16.vlgmr.msra.gmra.mxu1 %v1009_v55 }
 0x159   :  { %1366 = vmatpush.bf16.msrb.mxu0 %v2998_v42  ;;  %1379 = vmatpush.bf16.msrb.mxu1 %v3006_v43  ;;  %v1395_v42 = vpack.c.b16 %v1393_v38, %v1393_v38  ;;  %v1396_v43 = vpack.c.b16 %v1394_v39, %v1394_v39  ;;  %v3040_v38 = vld [vmem:[%s3783_s7 + $0x8] sm:$0xff] }
 0x15a   :  { %1245 = vmatmul.bf16.vlgmr.msra.gmra.mxu2 %v1137_v58  ;;  %1258 = vmatmul.bf16.vlgmr.msra.gmra.mxu3 %v1138_v59 }
 0x15b   :  { %1495 = vmatpush.bf16.msrb.mxu2 %v3014_v48  ;;  %1508 = vmatpush.bf16.msrb.mxu3 %v3022_v49  ;;  %v3028_v48 = vld [vmem:[%s3782_s6 + $0x28] sm:$0xff]  ;;  %v3027_v49 = vld [vmem:[%s3782_s6 + $0x20] sm:$0xff] }
 0x15d   :  { %1367 = vmatpush.bf16.msrb.mxu0 %v2997_v52  ;;  %1380 = vmatpush.bf16.msrb.mxu1 %v3005_v53  ;;  %v3029_v53 = vld [vmem:[%s3782_s6 + $0x30] sm:$0xff] }
 0x15f   :  { %1496 = vmatpush.bf16.msrb.mxu2 %v3013_v56  ;;  %1509 = vmatpush.bf16.msrb.mxu3 %v3021_v57  ;;  %v3032_v57 = vld [vmem:[%s3782_s6 + $0x48] sm:$0xff] }
 0x161   :  { %1368 = vmatpush.bf16.msrb.mxu0 %v2996_v60  ;;  %1381 = vmatpush.bf16.msrb.mxu1 %v3004_v61 }
 0x163   :  { %1497 = vmatpush.bf16.msrb.mxu2 %v3012_v62  ;;  %1510 = vmatpush.bf16.msrb.mxu3 %v3020_v63  ;;  %v3031_v62 = vld [vmem:[%s3782_s6 + $0x40] sm:$0xff] }
 0x165   :  { %1369 = vmatpush.bf16.msrb.mxu0 %v2995_v1  ;;  %1382 = vmatpush.bf16.msrb.mxu1 %v3003_v2  ;;  %v3034_v2 = vld [vmem:[%s3782_s6 + $0x58] sm:$0xff] }
 0x167   :  { %1498 = vmatpush.bf16.msrb.mxu2 %v3011_v7  ;;  %1511 = vmatpush.bf16.msrb.mxu3 %v3019_v8 }
 0x169   :  { %1370 = vmatpush.bf16.msrb.mxu0 %v2994_v16  ;;  %1383 = vmatpush.bf16.msrb.mxu1 %v3002_v9  ;;  %v3033_v16 = vld [vmem:[%s3782_s6 + $0x50] sm:$0xff]  ;;  %v3036_v9 = vld [vmem:[%s3782_s6 + $0x68] sm:$0xff] }
 0x16b   :  { %1499 = vmatpush.bf16.msrb.mxu2 %v3010_v18  ;;  %1512 = vmatpush.bf16.msrb.mxu3 %v3018_v19 }
 0x16d   :  { %1371 = vmatpush.bf16.msrb.mxu0 %v2993_v22  ;;  %1384 = vmatpush.bf16.msrb.mxu1 %v3001_v23 }
 0x16f   :  { %1500 = vmatpush.bf16.msrb.mxu2 %v3009_v26  ;;  %1513 = vmatpush.bf16.msrb.mxu3 %v3017_v27 }
 0x171   :  { %1372 = vmatpush.bf16.msrb.mxu0 %v2992_v15  ;;  %1385 = vmatpush.bf16.msrb.mxu1 %v3000_v29  ;;  %v3035_v15 = vld [vmem:[%s3782_s6 + $0x60] sm:$0xff] }
 0x173   :  { %1501 = vmatpush.bf16.msrb.mxu2 %v3008_v31  ;;  %1514 = vmatpush.bf16.msrb.mxu3 %v3016_v11 }
 0x175   :  { %1373 = vmatpush.bf16.msrb.mxu0 %v2991_v32  ;;  %1386 = vmatpush.bf16.msrb.mxu1 %v2999_v33 }
 0x177   :  { %1502 = vmatpush.bf16.msrb.mxu2 %v3007_v36  ;;  %1515 = vmatpush.bf16.msrb.mxu3 %v3015_v37 }
 0x178   :  { %1374 = vmatmul.bf16.vlgmr.msrb.gmra.mxu0 %v1266_v40  ;;  %1387 = vmatmul.bf16.vlgmr.msrb.gmra.mxu1 %v1267_v41 }
 0x179   :  { %1591 = vmatpush.bf16.msra.mxu0 %v3024_v44  ;;  %1619 = vmatpush.bf16.msra.mxu1 %v3026_v46 }
 0x17a   :  { %1503 = vmatmul.bf16.vlgmr.msrb.gmra.mxu2 %v1395_v42  ;;  %1516 = vmatmul.bf16.vlgmr.msrb.gmra.mxu3 %v1396_v43 }
 0x17b   :  { %1647 = vmatpush.bf16.msra.mxu2 %v3028_v48  ;;  %1675 = vmatpush.bf16.msra.mxu3 %v3030_v50 }
 0x17d   :  { %1592 = vmatpush.bf16.msra.mxu0 %v3023_v45  ;;  %1620 = vmatpush.bf16.msra.mxu1 %v3025_v47 }
 0x17f   :  { %1648 = vmatpush.bf16.msra.mxu2 %v3027_v49  ;;  %1676 = vmatpush.bf16.msra.mxu3 %v3029_v53 }
 0x181   :  { %1703 = vmatpush.bf16.msrb.mxu0 %v3032_v57  ;;  %1731 = vmatpush.bf16.msrb.mxu1 %v3034_v2  ;;  %v3041_v57 = vld [vmem:[%s3783_s7 + $0x10] sm:$0xff]  ;;  %v3047_v2 = vld [vmem:[%s3783_s7 + $0x40] sm:$0xff] }
 0x183   :  { %1759 = vmatpush.bf16.msrb.mxu2 %v3036_v9  ;;  %1787 = vmatpush.bf16.msrb.mxu3 %v3038_v10  ;;  %v3052_v10 = vld [vmem:[%s3783_s7 + $0x68] sm:$0xff] }
 0x185   :  { %1704 = vmatpush.bf16.msrb.mxu0 %v3031_v62  ;;  %1732 = vmatpush.bf16.msrb.mxu1 %v3033_v16  ;;  %v3049_v16 = vld [vmem:[%s3783_s7 + $0x50] sm:$0xff] }
 0x187   :  { %1760 = vmatpush.bf16.msrb.mxu2 %v3035_v15  ;;  %1788 = vmatpush.bf16.msrb.mxu3 %v3037_v30  ;;  %v3053_v15 = vld [vmem:[%s3783_s7 + $0x70] sm:$0xff] }
 0x1b5   :  { %v601_v51 = vpop.f32.mrf.mxu0  ;;  %v614_v52 = vpop.f32.mrf.mxu1 }
 0x1b6   :  { %v615_v54 = vadd.f32 %v614_v52, %v601_v51 }
 0x1b8   :  { %v1521_v55 = vmax.f32 %v615_v54, 0.0 }
 0x1ba   :  { %v1529_v56 = vpack.c.bf16 %v1521_v55, %v1521_v55  ;;  %v3039_v55 = vld [vmem:[%s3783_s7] sm:$0xff] }
 0x1bc   :  { %2758 = vmatmul.msk.bf16.vlgmr.msra.gmra.mxu0 %vm1581_vm7, %v1529_v56  ;;  %v3042_v56 = vld [vmem:[%s3783_s7 + $0x18] sm:$0xff] }
 0x1bd   :  { %v603_v58 = vpop.f32.mrf.mxu0  ;;  %v616_v59 = vpop.f32.mrf.mxu1  ;;  %1863 = vmatpush.bf16.msra.mxu0 %v3040_v38 }
 0x1be   :  { %v730_v60 = vpop.f32.mrf.mxu2  ;;  %v743_v61 = vpop.f32.mrf.mxu3  ;;  %v3044_v58 = vld [vmem:[%s3783_s7 + $0x28] sm:$0xff]  ;;  %v3043_v59 = vld [vmem:[%s3783_s7 + $0x20] sm:$0xff] }
 0x1bf   :  { %v744_v63 = vadd.f32 %v743_v61, %v730_v60  ;;  %v3046_v60 = vld [vmem:[%s3783_s7 + $0x38] sm:$0xff] }
 0x1c1   :  { %v1522_v0 = vmax.f32 %v744_v63, 0.0  ;;  %1864 = vmatpush.bf16.msra.mxu0 %v3039_v55  ;;  %v3048_v63 = vld [vmem:[%s3783_s7 + $0x48] sm:$0xff] }
 0x1c3   :  { %v1530_v1 = vpack.c.bf16 %v1522_v0, %v1522_v0 }
 0x1c5   :  { %2767 = vmatmul.msk.bf16.vlgmr.msra.gmra.mxu1 %vm1581_vm7, %v1530_v1  ;;  %v859_v3 = vpop.f32.mrf.mxu0  ;;  %v872_v4 = vpop.f32.mrf.mxu1  ;;  %v3045_v1 = vld [vmem:[%s3783_s7 + $0x30] sm:$0xff] }
 0x1c6   :  { %v732_v7 = vpop.f32.mrf.mxu2  ;;  %v745_v8 = vpop.f32.mrf.mxu3  ;;  %v873_v13 = vadd.f32 %v872_v4, %v859_v3  ;;  %1891 = vmatpush.bf16.msra.mxu1 %v3042_v56  ;;  %v3050_v3 = vld [vmem:[%s3783_s7 + $0x58] sm:$0xff] }
 0x1c8   :  { %v1523_v17 = vmax.f32 %v873_v13, 0.0 }
 0x1ca   :  { %v1531_v18 = vpack.c.bf16 %v1523_v17, %v1523_v17  ;;  %1892 = vmatpush.bf16.msra.mxu1 %v3041_v57  ;;  %v3054_v17 = vld [vmem:[%s3783_s7 + $0x78] sm:$0xff] }
 0x1cc   :  { %2776 = vmatmul.msk.bf16.vlgmr.msra.gmra.mxu2 %vm1581_vm7, %v1531_v18 }
 0x1cd   :  { %v861_v19 = vpop.f32.mrf.mxu0  ;;  %v874_v20 = vpop.f32.mrf.mxu1  ;;  %1919 = vmatpush.bf16.msra.mxu2 %v3044_v58 }
 0x1ce   :  { %v988_v21 = vpop.f32.mrf.mxu2  ;;  %v1001_v22 = vpop.f32.mrf.mxu3 }
 0x1cf   :  { %v1002_v23 = vadd.f32 %v1001_v22, %v988_v21 }
 0x1d1   :  { %v1524_v24 = vmax.f32 %v1002_v23, 0.0  ;;  %1920 = vmatpush.bf16.msra.mxu2 %v3043_v59 }
 0x1d3   :  { %v1532_v25 = vpack.c.bf16 %v1524_v24, %v1524_v24 }
 0x1d5   :  { %2785 = vmatmul.msk.bf16.vlgmr.msra.gmra.mxu3 %vm1581_vm7, %v1532_v25  ;;  %v1117_v28 = vpop.f32.mrf.mxu0  ;;  %v1130_v14 = vpop.f32.mrf.mxu1 }
 0x1d6   :  { %v990_v26 = vpop.f32.mrf.mxu2  ;;  %v1003_v27 = vpop.f32.mrf.mxu3  ;;  %v1131_v29 = vadd.f32 %v1130_v14, %v1117_v28  ;;  %1947 = vmatpush.bf16.msra.mxu3 %v3046_v60  ;;  %v3051_v28 = vld [vmem:[%s3783_s7 + $0x60] sm:$0xff] }
 0x1d8   :  { %v1525_v31 = vmax.f32 %v1131_v29, 0.0 }
 0x1da   :  { %v1533_v11 = vpack.c.bf16 %v1525_v31, %v1525_v31  ;;  %1948 = vmatpush.bf16.msra.mxu3 %v3045_v1 }
 0x1dc   :  { %2794 = vmatmul.msk.bf16.vlgmr.msrb.gmra.mxu0 %vm1581_vm7, %v1533_v11 }
 0x1dd   :  { %v1119_v33 = vpop.f32.mrf.mxu0  ;;  %v1132_v34 = vpop.f32.mrf.mxu1  ;;  %1975 = vmatpush.bf16.msrb.mxu0 %v3048_v63 }
 0x1de   :  { %v1246_v12 = vpop.f32.mrf.mxu2  ;;  %v1259_v32 = vpop.f32.mrf.mxu3 }
 0x1df   :  { %v1260_v35 = vadd.f32 %v1259_v32, %v1246_v12 }
 0x1e1   :  { %v1526_v36 = vmax.f32 %v1260_v35, 0.0  ;;  %1976 = vmatpush.bf16.msrb.mxu0 %v3047_v2 }
 0x1e3   :  { %v1534_v37 = vpack.c.bf16 %v1526_v36, %v1526_v36 }
 0x1e5   :  { %2803 = vmatmul.msk.bf16.vlgmr.msrb.gmra.mxu1 %vm1581_vm7, %v1534_v37 }
 0x1e6   :  { %v1248_v39 = vpop.f32.mrf.mxu2  ;;  %v1261_v40 = vpop.f32.mrf.mxu3  ;;  %2003 = vmatpush.bf16.msrb.mxu1 %v3050_v3 }
 0x1e7   :  { %v2074_v40 = vld [vmem:[%s3784_s8] sm:$0xf] }
 0x1ea   :  { %2004 = vmatpush.bf16.msrb.mxu1 %v3049_v16 }
 0x1f5   :  { %v1375_v41 = vpop.f32.mrf.mxu0  ;;  %v1388_v42 = vpop.f32.mrf.mxu1 }
 0x1f6   :  { %v1389_v43 = vadd.f32 %v1388_v42, %v1375_v41  ;;  %v2075_v41 = vunpack.c.l.bf16 %v2074_v40  ;;  %v3114_v40 = vmov 8.0  }
 0x1f7   :  { %3078 = vrcp.f32 %v3114_v40 }
 0x1f8   :  { %v1527_v44 = vmax.f32 %v1389_v43, 0.0  ;;  %v2084_v42 = vperm.slane %v2075_v41, 0  ;;  %v2078_v55 = vrot.slane %v2075_v41, 2  ;;  %v2080_v59 = vrot.slane %v2075_v41, 4 }
 0x1fa   :  { %v1535_v45 = vpack.c.bf16 %v1527_v44, %v1527_v44  ;;  %v2086_v56 = vperm.slane %v2078_v55, 0  ;;  %v2088_v63 = vperm.slane %v2080_v59, 0 }
 0x1fc   :  { %2812 = vmatmul.msk.bf16.vlgmr.msrb.gmra.mxu2 %vm1581_vm7, %v1535_v45 }
 0x1fd   :  { %v1377_v46 = vpop.f32.mrf.mxu0  ;;  %v1390_v47 = vpop.f32.mrf.mxu1  ;;  %2031 = vmatpush.bf16.msrb.mxu2 %v3052_v10 }
 0x1fe   :  { %v1504_v48 = vpop.f32.mrf.mxu2  ;;  %v1517_v49 = vpop.f32.mrf.mxu3  ;;  %v2077_v46 = vrot.slane %v2075_v41, 1 }
 0x1ff   :  { %v1518_v50 = vadd.f32 %v1517_v49, %v1504_v48 }
 0x200   :  { %v2085_v49 = vperm.slane %v2077_v46, 0 }
 0x201   :  { %v1528_v51 = vmax.f32 %v1518_v50, 0.0  ;;  %2032 = vmatpush.bf16.msrb.mxu2 %v3051_v28 }
 0x203   :  { %v1536_v52 = vpack.c.bf16 %v1528_v51, %v1528_v51 }
 0x205   :  { %2821 = vmatmul.msk.bf16.vlgmr.msrb.gmra.mxu3 %vm1581_vm7, %v1536_v52 }
 0x206   :  { %v1506_v53 = vpop.f32.mrf.mxu2  ;;  %v1519_v54 = vpop.f32.mrf.mxu3  ;;  %2059 = vmatpush.bf16.msrb.mxu3 %v3054_v17 }
 0x20a   :  { %2060 = vmatpush.bf16.msrb.mxu3 %v3053_v15  ;;  %v2083_v15 = vrot.slane %v2075_v41, 7 }
 0x239   :  { %v1594_v61 = vpop.f32.mrf.mxu0 }
 0x23a   :  { %v1794_v62 = vmax.f32 %v1594_v61, 0.0  ;;  %v2079_v61 = vrot.slane %v2075_v41, 3 }
 0x23c   :  { %v1802_v0 = vpack.c.bf16 %v1794_v62, %v1794_v62  ;;  %v2087_v3 = vperm.slane %v2079_v61, 0 }
 0x23e   :  { %2830 = vmatmul.msk.bf16.vlgmr.msra.gmra.mxu0 %vm1581_vm7, %v1802_v0 }
 0x241   :  { %v1596_v4 = vpop.f32.mrf.mxu0 }
 0x242   :  { %v1622_v7 = vpop.f32.mrf.mxu1 }
 0x243   :  { %v1795_v8 = vmax.f32 %v1622_v7, 0.0 }
 0x245   :  { %v1803_v13 = vpack.c.bf16 %v1795_v8, %v1795_v8 }
 0x247   :  { %2839 = vmatmul.msk.bf16.vlgmr.msra.gmra.mxu1 %vm1581_vm7, %v1803_v13  ;;  %v2081_v13 = vrot.slane %v2075_v41, 5 }
 0x24a   :  { %v1624_v9 = vpop.f32.mrf.mxu1 }
 0x24f   :  { %v1650_v18 = vpop.f32.mrf.mxu2 }
 0x250   :  { %v1796_v19 = vmax.f32 %v1650_v18, 0.0 }
 0x252   :  { %v1804_v20 = vpack.c.bf16 %v1796_v19, %v1796_v19 }
 0x254   :  { %2848 = vmatmul.msk.bf16.vlgmr.msra.gmra.mxu2 %vm1581_vm7, %v1804_v20  ;;  %v2089_v20 = vperm.slane %v2081_v13, 0 }
 0x257   :  { %v1652_v21 = vpop.f32.mrf.mxu2 }
 0x258   :  { %v1678_v22 = vpop.f32.mrf.mxu3 }
 0x259   :  { %v1797_v23 = vmax.f32 %v1678_v22, 0.0  ;;  %v1706_v25 = vpop.f32.mrf.mxu0 }
 0x25a   :  { %v1798_v26 = vmax.f32 %v1706_v25, 0.0  ;;  %v2082_v25 = vrot.slane %v2075_v41, 6 }
 0x25b   :  { %v1805_v24 = vpack.c.bf16 %v1797_v23, %v1797_v23 }
 0x25c   :  { %v1806_v27 = vpack.c.bf16 %v1798_v26, %v1798_v26  ;;  %v2090_v26 = vperm.slane %v2082_v25, 0 }
 0x25d   :  { %2857 = vmatmul.msk.bf16.vlgmr.msra.gmra.mxu3 %vm1581_vm7, %v1805_v24 }
 0x25e   :  { %2866 = vmatmul.msk.bf16.vlgmr.msrb.gmra.mxu0 %vm1581_vm7, %v1806_v27 }
 0x260   :  { %v1680_v14 = vpop.f32.mrf.mxu3 }
 0x261   :  { %v1708_v30 = vpop.f32.mrf.mxu0 }
 0x262   :  { %v1734_v29 = vpop.f32.mrf.mxu1 }
 0x263   :  { %v1799_v31 = vmax.f32 %v1734_v29, 0.0 }
 0x265   :  { %v1807_v11 = vpack.c.bf16 %v1799_v31, %v1799_v31  ;;  %v2091_v31 = vperm.slane %v2083_v15, 0 }
 0x267   :  { %2875 = vmatmul.msk.bf16.vlgmr.msrb.gmra.mxu1 %vm1581_vm7, %v1807_v11 }
 0x26a   :  { %v1736_v12 = vpop.f32.mrf.mxu1 }
 0x27f   :  { %v1762_v32 = vpop.f32.mrf.mxu2 }
 0x280   :  { %v1800_v33 = vmax.f32 %v1762_v32, 0.0 }
 0x282   :  { %v1808_v34 = vpack.c.bf16 %v1800_v33, %v1800_v33 }
 0x284   :  { %2884 = vmatmul.msk.bf16.vlgmr.msrb.gmra.mxu2 %vm1581_vm7, %v1808_v34 }
 0x287   :  { %v1764_v35 = vpop.f32.mrf.mxu2 }
 0x288   :  { %v1790_v36 = vpop.f32.mrf.mxu3 }
 0x289   :  { %v1801_v37 = vmax.f32 %v1790_v36, 0.0 }
 0x28b   :  { %v1809_v38 = vpack.c.bf16 %v1801_v37, %v1801_v37 }
 0x28d   :  { %2893 = vmatmul.msk.bf16.vlgmr.msrb.gmra.mxu3 %vm1581_vm7, %v1809_v38 }
 0x290   :  { %v1792_v39 = vpop.f32.mrf.mxu3 }
 0x291   :  { %v2140_v39 = vlaneseq }
 0x293   :  { %v2141_v41 = vand.u32 127, %v2140_v39 }
 0x2bb   :  { %v1866_v43 = vpop.f32.mrf.mxu0 }
 0x2bc   :  { %v2066_v44 = vmax.f32 %v1866_v43, 0.0 }
 0x2be   :  { %v2100_v45 = vmul.f32 %v2084_v42, %v2066_v44 }
 0x2c0   :  { %v2108_v47 = vsel %vm1581_vm7, %v2100_v45, 0.0 }
 0x2c1   :  { %2109 = vadd.xlane.f32.xlu1 %v2108_v47 }
 0x2c3   :  { %v1868_v48 = vpop.f32.mrf.mxu0 }
 0x2c4   :  { %v1894_v50 = vpop.f32.mrf.mxu1 }
 0x2c5   :  { %v2067_v51 = vmax.f32 %v1894_v50, 0.0 }
 0x2c7   :  { %v2101_v52 = vmul.f32 %v2085_v49, %v2067_v51  ;;  %v3079_v49 = vpop.eup %3078 }
 0x2c8   :  { %vm138_vm9 = vweird.f32 %v3079_v49 }
 0x2c9   :  { %v2111_v53 = vsel %vm1581_vm7, %v2101_v52, 0.0 }
 0x2ca   :  { %2112 = vadd.xlane.f32.xlu2 %v2111_v53 }
 0x2cc   :  { %v1896_v54 = vpop.f32.mrf.mxu1 }
 0x2cd   :  { %v134_v54 = vmul.f32 8.0, %v3079_v49 }
 0x2d7   :  { %v1922_v57 = vpop.f32.mrf.mxu2 }
 0x2d8   :  { %v2068_v58 = vmax.f32 %v1922_v57, 0.0 }
 0x2da   :  { %v2102_v60 = vmul.f32 %v2086_v56, %v2068_v58 }
 0x2db   :  { %v1978_v0 = vpop.f32.mrf.mxu0 }
 0x2dc   :  { %v2114_v62 = vsel %vm1581_vm7, %v2102_v60, 0.0  ;;  %v2070_v1 = vmax.f32 %v1978_v0, 0.0 }
 0x2dd   :  { %2115 = vadd.xlane.f32.xlu2 %v2114_v62  ;;  %v135_v62 = vsub.f32 1.0, %v134_v54 }
 0x2de   :  { %v2104_v7 = vmul.f32 %v2088_v63, %v2070_v1 }
 0x2df   :  { %v1924_v2 = vpop.f32.mrf.mxu2 }
 0x2e0   :  { %v1950_v4 = vpop.f32.mrf.mxu3  ;;  %v2120_v10 = vsel %vm1581_vm7, %v2104_v7, 0.0 }
 0x2e1   :  { %v2069_v8 = vmax.f32 %v1950_v4, 0.0 }
 0x2e3   :  { %v2103_v16 = vmul.f32 %v2087_v3, %v2069_v8  ;;  %v1980_v17 = vpop.f32.mrf.mxu0  ;;  %v136_v3 = vmul.f32 %v3079_v49, %v135_v62 }
 0x2e4   :  { %v2006_v9 = vpop.f32.mrf.mxu1 }
 0x2e5   :  { %v2071_v18 = vmax.f32 %v2006_v9, 0.0  ;;  %v2117_v19 = vsel %vm1581_vm7, %v2103_v16, 0.0  ;;  %2121 = vadd.xlane.f32.xlu2 %v2120_v10  ;;  %v137_v8 = vadd.f32 %v3079_v49, %v136_v3 }
 0x2e6   :  { %2118 = vadd.xlane.f32.xlu0 %v2117_v19 }
 0x2e7   :  { %v2105_v22 = vmul.f32 %v2089_v20, %v2071_v18  ;;  %v139_v9 = vsel %vm138_vm9, %v3079_v49, %v137_v8 }
 0x2e8   :  { %v1952_v21 = vpop.f32.mrf.mxu3 }
 0x2e9   :  { %v2123_v24 = vsel %vm1581_vm7, %v2105_v22, 0.0 }
 0x2ec   :  { %v2008_v23 = vpop.f32.mrf.mxu1 }
 0x2ee   :  { %2124 = vadd.xlane.f32.xlu0 %v2123_v24 }
 0x307   :  { %v2034_v27 = vpop.f32.mrf.mxu2 }
 0x308   :  { %v2072_v28 = vmax.f32 %v2034_v27, 0.0 }
 0x30a   :  { %v2106_v14 = vmul.f32 %v2090_v26, %v2072_v28 }
 0x30c   :  { %v2126_v29 = vsel %vm1581_vm7, %v2106_v14, 0.0  ;;  %v2210_v14 = vld [vmem:[%s3780_s4] sm:$0xff] }
 0x30d   :  { %2127 = vadd.xlane.f32.xlu2 %v2126_v29 }
 0x30f   :  { %v2036_v30 = vpop.f32.mrf.mxu2 }
 0x310   :  { %v2062_v11 = vpop.f32.mrf.mxu3  ;;  %v3116_v30 = vmov -1.0  }
 0x311   :  { %v2073_v12 = vmax.f32 %v2062_v11, 0.0 }
 0x313   :  { %v2107_v32 = vmul.f32 %v2091_v31, %v2073_v12 }
 0x315   :  { %v2129_v33 = vsel %vm1581_vm7, %v2107_v32, 0.0  ;;  %123 = vadd.xlane.f32.xlu2 %v3390_v6 }
 0x316   :  { %2130 = vadd.xlane.f32.xlu0 %v2129_v33 }
 0x318   :  { %v2064_v34 = vpop.f32.mrf.mxu3 }
 0x334   :  { %v2110_v42 = vpop.xlane.xlu1 %2109 }
 0x335   :  { %v2142_v47 = vperm.slane %v2110_v42, %v2141_v41 }
 0x33d   :  { %v2113_v35 = vpop.xlane.xlu2 %2112 }
 0x33e   :  { %v2143_v43 = vperm.slane %v2113_v35, %v2141_v41 }
 0x340   :  { %v2150_v6 = vsel %vm156_vm0, %v2143_v43, %v2142_v47 }
 0x350   :  { %v2116_v36 = vpop.xlane.xlu2 %2115 }
 0x351   :  { %v2144_v45 = vperm.slane %v2116_v36, %v2141_v41 }
 0x353   :  { %v2151_v50 = vsel %vm159_vm1, %v2144_v45, %v2150_v6 }
 0x358   :  { %v2122_v38 = vpop.xlane.xlu2 %2121 }
 0x359   :  { %v2119_v37 = vpop.xlane.xlu0 %2118  ;;  %v2146_v51 = vperm.slane %v2122_v38, %v2141_v41 }
 0x35a   :  { %v2145_v48 = vperm.slane %v2119_v37, %v2141_v41 }
 0x35c   :  { %v2152_v52 = vsel %vm162_vm2, %v2145_v48, %v2151_v50 }
 0x35d   :  { %v2153_v57 = vsel %vm165_vm3, %v2146_v51, %v2152_v52 }
 0x361   :  { %v2125_v46 = vpop.xlane.xlu0 %2124 }
 0x362   :  { %v2147_v53 = vperm.slane %v2125_v46, %v2141_v41 }
 0x364   :  { %v2154_v61 = vsel %vm168_vm4, %v2147_v53, %v2153_v57 }
 0x380   :  { %v2128_v44 = vpop.xlane.xlu2 %2127 }
 0x381   :  { %v2148_v55 = vperm.slane %v2128_v44, %v2141_v41 }
 0x383   :  { %v2155_v0 = vsel %vm171_vm5, %v2148_v55, %v2154_v61 }
 0x388   :  { %v124_v56 = vpop.xlane.xlu2 %123 }
 0x389   :  { %v2131_v58 = vpop.xlane.xlu0 %2130  ;;  %v2237_v59 = vadd.f32 -200.0, %v124_v56 }
 0x38a   :  { %v2149_v60 = vperm.slane %v2131_v58, %v2141_v41 }
 0x38b   :  { %v126_v63 = vmul.f32 %v2237_v59, %v2237_v59 }
 0x38c   :  { %v2157_v1 = vsel %vm2156_vm8, %v2149_v60, %v2155_v0 }
 0x38d   :  { %v127_v2 = vrot.slane %v126_v63, 4  ;;  %2159 = vxpose.xlu0.b32.start.end [1/1] (short) (narrow) %v2157_v1, 8 }
 0x38f   :  { %v128_v4 = vadd.f32 %v127_v2, %v126_v63 }
 0x391   :  { %v129_v7 = vrot.slane %v128_v4, 2 }
 0x393   :  { %v130_v13 = vadd.f32 %v129_v7, %v128_v4 }
 0x395   :  { %v131_v16 = vrot.slane %v130_v13, 1 }
 0x397   :  { %v132_v10 = vadd.f32 %v131_v16, %v130_v13 }
 0x399   :  { %v140_v17 = vmul.f32 %v139_v9, %v132_v10 }
 0x39b   :  { %142 = vst.msk [vmem:[#allocation2] sm:$0x1] %vm141_vm10, %v140_v17 }
 0x39c   :  { %2227 = dma.vmem_to_hbm [thread:$0]  %s2223_s19, 16, %s2225_s1, [#allocation3]  }
 0x3f4   :  { %3063 = vset.pattern.permute.xlu0 %v3111_v5 }
 0x431   :  { %v2175_v18 = vpop.trf.xlu0 }
 0x432   :  { %v2894_v19 = vmul.f32 -1.442695, %v2175_v18 }
 0x434   :  { %3080 = vpow2.f32 %v2894_v19 }
 0x43a   :  { %v3081_v20 = vpop.eup %3080 }
 0x43b   :  { %v2194_v21 = vadd.f32 1.0, %v3081_v20 }
 0x43d   :  { %3082 = vrcp.f32 %v2194_v21  ;;  %v2206_v25 = vand.u32 2147483648, %v2194_v21  ;;  %v2204_v27 = vand.u32 2147483647, %v2194_v21  ;;  %vm2200_vm12 = vweird.f32 %v2194_v21 }
 0x43f   :  { %v2207_v5 = vor.u32 1.1754944e-38, %v2206_v25  ;;  %vm2205_vm14 = vcmp.eq.f32.partialorder %v2204_v27, 8.507059e+37 }
 0x443   :  { %v3083_v22 = vpop.eup %3082 }
 0x444   :  { %v2196_v23 = vmul.f32 %v3083_v22, %v2194_v21  ;;  %vm2201_vm11 = vweird.f32 %v3083_v22 }
 0x445   :  { %vm2202_vm13 = vmor %vm2200_vm12, %vm2201_vm11 }
 0x446   :  { %v2197_v24 = vsub.f32 1.0, %v2196_v23 }
 0x448   :  { %v2198_v26 = vmul.f32 %v3083_v22, %v2197_v24 }
 0x44a   :  { %v2199_v28 = vadd.f32 %v3083_v22, %v2198_v26 }
 0x44c   :  { %v2203_v15 = vsel %vm2202_vm13, %v3083_v22, %v2199_v28 }
 0x44d   :  { %v2208_v29 = vsel %vm2205_vm14, %v2207_v5, %v2203_v15 }
 0x44e   :  { %vm2211_vm0 = vcmp.ge.f32.partialorder %v2208_v29, %v2210_v14 }
 0x44f   :  { %v2212_v31 = vsel %vm2211_vm0, 1.0, %v3116_v30 }
 0x450   :  { %2214 = vst.msk [vmem:[%s3785_s9] sm:$0xff] %vm2213_vm15, %v2212_v31 }
 0x451   :  { %3108 = dma.done.wait [#allocation3], 16  }
 0x452   :  { %3109 = vsyncadd [#allocation3], 4294967280 }
 0x453   :  { %2234 = vsyncpa [#allocation3], 1 }

</bundles_post_ra>
